<compile_context>
chip_gen: v6e
topology: v6e:2x2x1
jax: 0.10.0
libtpu: 0.0.40
codegen_flags: <defaults>
</compile_context>

<pallas_src>
import jax
import jax.numpy as jnp
from jax.experimental import pallas as pl
from jax.experimental.pallas import tpu as pltpu


def _vmem_capacity_bytes():
    """Physical VMEM capacity per TensorCore (conservative fallback if query fails)."""
    try:
        info = pltpu.get_tpu_info()
        for attr in ("vmem_capacity_bytes", "vmem_bytes", "vmem_size_bytes"):
            cap = getattr(info, attr, None)
            if cap:
                return int(cap)
    except Exception:
        pass
    return 64 * 1024 * 1024   # v7x per-TC size; safe lower bound everywhere


def _pick_thw(HW, TB, C, itembytes, block_budget_bytes):
    """128-aligned HW tile chosen purely from a byte budget (no element cap)."""
    cap = max(128, (block_budget_bytes // max(TB * C * itembytes, 1)) // 128 * 128)
    hw_pad = -(-HW // 128) * 128
    if hw_pad <= cap:
        return hw_pad                      # whole (128-padded) HW in one block
    t = cap
    while t >= 128:                        # prefer an even divisor: no masked tail
        if HW % t == 0:
            return t
        t -= 128
    return cap                             # no divisor fits: masked final block


def _make_kernel(*, THW, HW, needs_mask):
    n_chunks = THW // 128

    def kernel(x_ref, ss_ref, w_ref, b_ref, o_ref, acc_ref):
        # x_ref:   [TB, C, THW]  (f32 or bf16, streamed straight from HBM)
        # ss_ref:  [2, C, 128]   f32  (row 0 = BN scale lane-splat, row 1 = BN shift)
        # w_ref:   [C, NOP]      f32  (Linear weight^T, 1/HW folded in, NO padded to NOP)
        # b_ref:   [1, NOP]      f32
        # o_ref:   [TB, NOP]     f32
        # acc_ref: [TB, C, 128]  f32  (VMEM scratch: per-lane-group partial spatial sums)
        hw_idx = pl.program_id(1)

        @pl.when(hw_idx == 0)
        def _():
            acc_ref[...] = jnp.zeros_like(acc_ref)

        # Lane splat was done once in the wrapper; only cheap leading-dim broadcast remains.
        scale = ss_ref[0]                  # [C, 128]
        shift = ss_ref[1]                  # [C, 128]

        def chunk(off):
            xg = x_ref[:, :, pl.ds(off, 128)].astype(jnp.float32)     # [TB, C, 128]
            yg = jnp.maximum(xg * scale + shift, 0.0)
            if needs_mask:                 # only emitted when HW is not tile-aligned
                lane = jax.lax.broadcasted_iota(jnp.int32, yg.shape, 2)
                yg = jnp.where(hw_idx * THW + off + lane < HW, yg, 0.0)
            return yg

        if n_chunks <= 8:                  # small tiles: fully unrolled VPU adds
            part = chunk(0)
            for g in range(1, n_chunks):
                part = part + chunk(g * 128)
        else:                              # big tiles: bounded code size
            def body(g, p):
                return p + chunk(pl.multiple_of(g * 128, 128))
            part = jax.lax.fori_loop(1, n_chunks, body, chunk(0), unroll=4)
        acc_ref[...] += part

        @pl.when(hw_idx == pl.num_programs(1) - 1)
        def _():
            pooled = jnp.sum(acc_ref[...], axis=-1)     # single lane-reduce: [TB, C]
            out = jnp.dot(pooled, w_ref[...],
                          preferred_element_type=jnp.float32) + b_ref[...]
            o_ref[...] = out.astype(o_ref.dtype)

    return kernel


def bn_relu_pool_lin(x_nchw, gamma, beta, running_mean, running_var,
                     lin_weight, lin_bias, eps=1e-5, block_budget_bytes=None):
    """Eval-mode BN -> ReLU -> global-average-pool -> Linear.

    x_nchw: [B, C, H, W], f32 or bf16 (streamed as-is, no wrapper-side cast).
    lin_weight: [NO, C] (PyTorch layout); lin_bias: [NO]. Returns f32 [B, NO].
    """
    B, C, H, W = x_nchw.shape
    NO = lin_weight.shape[0]
    HW = H * W
    NOP = ((NO + 127) // 128) * 128                     # lane-dense padded output width
    f32 = jnp.float32

    # ---- folded constants (built once in plain JAX, all tiny) ----
    scale = gamma.astype(f32) / jnp.sqrt(running_var.astype(f32) + eps)   # [C]
    shift = beta.astype(f32) - running_mean.astype(f32) * scale           # [C]
    ss = jnp.broadcast_to(jnp.stack([scale, shift], axis=0)[:, :, None], (2, C, 128))

    w_t = lin_weight.astype(f32).T / HW                                   # [C, NO], 1/HW folded
    w_pad = jnp.zeros((C, NOP), f32).at[:, :NO].set(w_t)
    b_pad = jnp.zeros((1, NOP), f32).at[0, :NO].set(lin_bias.astype(f32))

    x3 = x_nchw.reshape(B, C, HW)                       # free reshape; dtype untouched
    itembytes = jnp.dtype(x3.dtype).itemsize

    # ---- generation-aware tile sizes ----
    vmem_cap = _vmem_capacity_bytes()
    if block_budget_bytes is None:
        block_budget_bytes = max(vmem_cap // 8, 1 << 20)   # ~16 MiB v5e/v6e, ~8 MiB v7x
    TB = 8 if B % 8 == 0 else B                         # out-block needs 8 | TB or TB == B
    THW = _pick_thw(HW, TB, C, itembytes, block_budget_bytes)
    grid_hw = -(-HW // THW)
    needs_mask = grid_hw * THW != HW
    grid = (B // TB, grid_hw)

    # Explicit scoped-VMEM limit (v5e default is only 16 MiB): 2x x-block + double-buffered
    # params + out block + accumulator, plus slack; capped at ~90% of physical VMEM.
    needed = (2 * TB * C * THW * itembytes
              + 2 * (2 * C * 128 + C * NOP + NOP) * 4
              + 2 * TB * NOP * 4
              + TB * C * 128 * 4)
    vmem_limit = int(min(max(needed + (4 << 20), 16 << 20), int(vmem_cap * 0.9)))

    kernel = _make_kernel(THW=THW, HW=HW, needs_mask=needs_mask)

    out = pl.pallas_call(
        kernel,
        out_shape=jax.ShapeDtypeStruct((B, NOP), f32),
        grid_spec=pltpu.PrefetchScalarGridSpec(
            num_scalar_prefetch=0,
            grid=grid,
            in_specs=[
                pl.BlockSpec((TB, C, THW), lambda bi, hi: (bi, 0, hi)),
                pl.BlockSpec((2, C, 128), lambda bi, hi: (0, 0, 0)),
                pl.BlockSpec((C, NOP), lambda bi, hi: (0, 0)),
                pl.BlockSpec((1, NOP), lambda bi, hi: (0, 0)),
            ],
            out_specs=pl.BlockSpec((TB, NOP), lambda bi, hi: (bi, 0)),
            scratch_shapes=[pltpu.VMEM((TB, C, 128), f32)],
        ),
        compiler_params=pltpu.CompilerParams(
            dimension_semantics=("parallel", "arbitrary"),
            vmem_limit_bytes=vmem_limit),
    )(x3, ss, w_pad, b_pad)

    return out[:, :NO]


def reference(x_nchw, gamma, beta, running_mean, running_var,
              lin_weight, lin_bias, eps=1e-5):
    # Pure-JAX reference mirroring the PyTorch forward (eval-mode BN).
    x = x_nchw.astype(jnp.float32)
    xn = (x - running_mean[None, :, None, None]) / jnp.sqrt(
        running_var[None, :, None, None] + eps)
    xn = xn * gamma[None, :, None, None] + beta[None, :, None, None]
    xn = jnp.maximum(xn, 0.0)
    pooled = xn.reshape(xn.shape[0], xn.shape[1], -1).mean(axis=-1)
    return pooled @ lin_weight.T + lin_bias[None, :]


if __name__ == "__main__":
    key = jax.random.PRNGKey(0)
    kx, kg, kb, km, kv, kw, kbias, kx2 = jax.random.split(key, 8)

    B, C, H, W = 2, 4, 16, 16    # ni = 4
    NO = 8                       # no = 8

    x = jax.random.normal(kx, (B, C, H, W), dtype=jnp.float32)
    gamma = 1.0 + 0.1 * jax.random.normal(kg, (C,), dtype=jnp.float32)
    beta = 0.1 * jax.random.normal(kb, (C,), dtype=jnp.float32)
    running_mean = 0.1 * jax.random.normal(km, (C,), dtype=jnp.float32)
    running_var = jnp.abs(1.0 + 0.1 * jax.random.normal(kv, (C,), dtype=jnp.float32))
    lin_weight = jax.random.normal(kw, (NO, C), dtype=jnp.float32) / jnp.sqrt(C)
    lin_bias = jax.random.normal(kbias, (NO,), dtype=jnp.float32) / jnp.sqrt(C)

    ref = reference(x, gamma, beta, running_mean, running_var, lin_weight, lin_bias)

    # 1) f32 input, default tiling (single HW block).
    out = jax.block_until_ready(bn_relu_pool_lin(
        x, gamma, beta, running_mean, running_var, lin_weight, lin_bias))
    assert out.shape == (B, NO)
    assert jnp.allclose(out, ref, atol=1e-5, rtol=1e-5), (out, ref)

    # 2) f32 input, forced small HW blocks (2 grid steps) -> exercises the VMEM accumulator.
    out2 = jax.block_until_ready(bn_relu_pool_lin(
        x, gamma, beta, running_mean, running_var, lin_weight, lin_bias,
        block_budget_bytes=4096))
    assert jnp.allclose(out2, ref, atol=1e-5, rtol=1e-5), (out2, ref)

    # 3) bf16 input produced upstream (NO wrapper-side cast), forced multi-step tiling.
    x_bf16 = x.astype(jnp.bfloat16)   # simulates a producer that already emits bf16
    ref_bf = reference(x_bf16, gamma, beta, running_mean, running_var, lin_weight, lin_bias)
    out3 = jax.block_until_ready(bn_relu_pool_lin(
        x_bf16, gamma, beta, running_mean, running_var, lin_weight, lin_bias,
        block_budget_bytes=2048))
    assert jnp.allclose(out3, ref_bf, atol=1e-4, rtol=1e-4), (out3, ref_bf)

    # 4) Odd spatial size (7x7 head) with B=16: masked 128-aligned tail, TB=8, batch grid = 2.
    B2, H2, W2 = 16, 7, 7
    x4 = jax.random.normal(kx2, (B2, C, H2, W2), dtype=jnp.float32)
    ref4 = reference(x4, gamma, beta, running_mean, running_var, lin_weight, lin_bias)
    out4 = jax.block_until_ready(bn_relu_pool_lin(
        x4, gamma, beta, running_mean, running_var, lin_weight, lin_bias))
    assert out4.shape == (B2, NO)
    assert jnp.allclose(out4, ref4, atol=1e-5, rtol=1e-5), (out4, ref4)

    print("KERNEL_OK")
</pallas_src>

<mosaic_0001>
module attributes {stable_mosaic.version = 11 : i64} {
  func.func @kernel(%arg0: i32, %arg1: i32, %arg2: memref<2x4x256xf32, #tpu.memory_space<vmem>>, %arg3: memref<2x4x128xf32, #tpu.memory_space<vmem>>, %arg4: memref<4x128xf32, #tpu.memory_space<vmem>>, %arg5: memref<1x128xf32, #tpu.memory_space<vmem>>, %arg6: memref<2x128xf32, #tpu.memory_space<vmem>>, %arg7: memref<2x4x128xf32, #tpu.memory_space<vmem>>) attributes {dimension_semantics = [#tpu.dimension_semantics<parallel>, #tpu.dimension_semantics<arbitrary>], iteration_bounds = array<i64: 1, 1>, scalar_prefetch = 0 : i64, scratch_operands = 1 : i64, tpu.core_type = #tpu.core_type<tc>, window_params = [{transform_indices = @transform_0, window_bounds = array<i64: 2, 4, 256>}, {pipeline_mode = #tpu.pipeline_mode<synchronous>, transform_indices = @transform_1, window_bounds = array<i64: 2, 4, 128>}, {pipeline_mode = #tpu.pipeline_mode<synchronous>, transform_indices = @transform_2, window_bounds = array<i64: 4, 128>}, {pipeline_mode = #tpu.pipeline_mode<synchronous>, transform_indices = @transform_3, window_bounds = array<i64: 1, 128>}, {transform_indices = @transform_4, window_bounds = array<i64: 2, 128>}]} {
    %c0_i32 = arith.constant 0 : i32
    %0 = arith.cmpi eq, %arg1, %c0_i32 : i32
    %1 = arith.extui %0 : i1 to i32
    %c0_i32_0 = arith.constant 0 : i32
    %2 = arith.cmpi ne, %1, %c0_i32_0 : i32
    scf.if %2 {
      %cst_19 = arith.constant 0.000000e+00 : f32
      %32 = vector.broadcast %cst_19 : f32 to vector<2x4x128xf32>
      %c0_20 = arith.constant 0 : index
      %c0_21 = arith.constant 0 : index
      %c0_22 = arith.constant 0 : index
      %33 = vector.load %arg7[%c0_20, %c0_21, %c0_22] : memref<2x4x128xf32, #tpu.memory_space<vmem>>, vector<2x4x128xf32>
      tpu.vector_store %arg7[%c0_20, %c0_21, %c0_22], %32 {strides = array<i32>} : memref<2x4x128xf32, #tpu.memory_space<vmem>>, vector<2x4x128xf32>,
    } else {
    }
    %c0 = arith.constant 0 : index
    %c0_1 = arith.constant 0 : index
    %c0_2 = arith.constant 0 : index
    %3 = vector.load %arg3[%c0, %c0_1, %c0_2] : memref<2x4x128xf32, #tpu.memory_space<vmem>>, vector<1x4x128xf32>
    %4 = vector.shape_cast %3 : vector<1x4x128xf32> to vector<4x128xf32>
    %c1 = arith.constant 1 : index
    %c0_3 = arith.constant 0 : index
    %c0_4 = arith.constant 0 : index
    %5 = vector.load %arg3[%c1, %c0_3, %c0_4] : memref<2x4x128xf32, #tpu.memory_space<vmem>>, vector<1x4x128xf32>
    %6 = vector.shape_cast %5 : vector<1x4x128xf32> to vector<4x128xf32>
    %c0_5 = arith.constant 0 : index
    %c0_6 = arith.constant 0 : index
    %c0_7 = arith.constant 0 : index
    %7 = vector.load %arg2[%c0_5, %c0_6, %c0_7] : memref<2x4x256xf32, #tpu.memory_space<vmem>>, vector<2x4x128xf32>
    %8 = vector.shape_cast %4 : vector<4x128xf32> to vector<1x4x128xf32>
    %9 = vector.broadcast %8 : vector<1x4x128xf32> to vector<2x4x128xf32>
    %10 = arith.mulf %7, %9 : vector<2x4x128xf32>
    %11 = vector.shape_cast %6 : vector<4x128xf32> to vector<1x4x128xf32>
    %12 = vector.broadcast %11 : vector<1x4x128xf32> to vector<2x4x128xf32>
    %13 = arith.addf %10, %12 : vector<2x4x128xf32>
    %cst = arith.constant 0.000000e+00 : f32
    %14 = vector.broadcast %cst : f32 to vector<2x4x128xf32>
    %15 = arith.maximumf %13, %14 : vector<2x4x128xf32>
    %c0_8 = arith.constant 0 : index
    %c0_9 = arith.constant 0 : index
    %c128 = arith.constant 128 : index
    %16 = vector.load %arg2[%c0_8, %c0_9, %c128] : memref<2x4x256xf32, #tpu.memory_space<vmem>>, vector<2x4x128xf32>
    %17 = vector.shape_cast %4 : vector<4x128xf32> to vector<1x4x128xf32>
    %18 = vector.broadcast %17 : vector<1x4x128xf32> to vector<2x4x128xf32>
    %19 = arith.mulf %16, %18 : vector<2x4x128xf32>
    %20 = vector.shape_cast %6 : vector<4x128xf32> to vector<1x4x128xf32>
    %21 = vector.broadcast %20 : vector<1x4x128xf32> to vector<2x4x128xf32>
    %22 = arith.addf %19, %21 : vector<2x4x128xf32>
    %cst_10 = arith.constant 0.000000e+00 : f32
    %23 = vector.broadcast %cst_10 : f32 to vector<2x4x128xf32>
    %24 = arith.maximumf %22, %23 : vector<2x4x128xf32>
    %25 = arith.addf %15, %24 : vector<2x4x128xf32>
    %c0_11 = arith.constant 0 : index
    %c0_12 = arith.constant 0 : index
    %c0_13 = arith.constant 0 : index
    %26 = vector.load %arg7[%c0_11, %c0_12, %c0_13] : memref<2x4x128xf32, #tpu.memory_space<vmem>>, vector<2x4x128xf32>
    %27 = arith.addf %26, %25 : vector<2x4x128xf32>
    %c0_14 = arith.constant 0 : index
    %c0_15 = arith.constant 0 : index
    %c0_16 = arith.constant 0 : index
    %28 = vector.load %arg7[%c0_14, %c0_15, %c0_16] : memref<2x4x128xf32, #tpu.memory_space<vmem>>, vector<2x4x128xf32>
    tpu.vector_store %arg7[%c0_14, %c0_15, %c0_16], %27 {strides = array<i32>} : memref<2x4x128xf32, #tpu.memory_space<vmem>>, vector<2x4x128xf32>,
    %c0_i32_17 = arith.constant 0 : i32
    %29 = arith.cmpi eq, %arg1, %c0_i32_17 : i32
    %30 = arith.extui %29 : i1 to i32
    %c0_i32_18 = arith.constant 0 : i32
    %31 = arith.cmpi ne, %30, %c0_i32_18 : i32
    scf.if %31 {
      %c0_19 = arith.constant 0 : index
      %c0_20 = arith.constant 0 : index
      %c0_21 = arith.constant 0 : index
      %32 = vector.load %arg7[%c0_19, %c0_20, %c0_21] : memref<2x4x128xf32, #tpu.memory_space<vmem>>, vector<2x4x128xf32>
      %cst_22 = arith.constant dense<0.000000e+00> : vector<2x4xf32>
      %33 = vector.multi_reduction <add>, %32, %cst_22 [2] : vector<2x4x128xf32> to vector<2x4xf32>
      %c0_23 = arith.constant 0 : index
      %c0_24 = arith.constant 0 : index
      %34 = vector.load %arg4[%c0_23, %c0_24] : memref<4x128xf32, #tpu.memory_space<vmem>>, vector<4x128xf32>
      %cst_25 = arith.constant dense<0.000000e+00> : vector<2x128xf32>
      %35 = tpu.matmul %33, %34, %cst_25 {dimension_numbers = #tpu.dot_dimension_numbers<[1], [0], [0], [1], [0, 0, 1, 1], [], []>} : vector<2x4xf32>, vector<4x128xf32>, vector<2x128xf32> -> vector<2x128xf32>
      %c0_26 = arith.constant 0 : index
      %c0_27 = arith.constant 0 : index
      %36 = vector.load %arg5[%c0_26, %c0_27] : memref<1x128xf32, #tpu.memory_space<vmem>>, vector<1x128xf32>
      %37 = vector.broadcast %36 : vector<1x128xf32> to vector<2x128xf32>
      %38 = arith.addf %35, %37 : vector<2x128xf32>
      %c0_28 = arith.constant 0 : index
      %c0_29 = arith.constant 0 : index
      %39 = vector.load %arg6[%c0_28, %c0_29] : memref<2x128xf32, #tpu.memory_space<vmem>>, vector<2x128xf32>
      tpu.vector_store %arg6[%c0_28, %c0_29], %38 {strides = array<i32>} : memref<2x128xf32, #tpu.memory_space<vmem>>, vector<2x128xf32>,
    } else {
    }
    return
  }
  func.func @transform_0(%arg0: i32, %arg1: i32) -> (i32, i32, i32) {
    %c0_i32 = arith.constant 0 : i32
    %c0_i32_0 = arith.constant 0 : i32
    return %arg0, %c0_i32, %arg1 : i32, i32, i32
  }
  func.func @transform_1(%arg0: i32, %arg1: i32) -> (i32, i32, i32) {
    %c0_i32 = arith.constant 0 : i32
    %c0_i32_0 = arith.constant 0 : i32
    %c0_i32_1 = arith.constant 0 : i32
    %c0_i32_2 = arith.constant 0 : i32
    return %c0_i32, %c0_i32_0, %c0_i32_1 : i32, i32, i32
  }
  func.func @transform_2(%arg0: i32, %arg1: i32) -> (i32, i32) {
    %c0_i32 = arith.constant 0 : i32
    %c0_i32_0 = arith.constant 0 : i32
    %c0_i32_1 = arith.constant 0 : i32
    return %c0_i32, %c0_i32_0 : i32, i32
  }
  func.func @transform_3(%arg0: i32, %arg1: i32) -> (i32, i32) {
    %c0_i32 = arith.constant 0 : i32
    %c0_i32_0 = arith.constant 0 : i32
    %c0_i32_1 = arith.constant 0 : i32
    return %c0_i32, %c0_i32_0 : i32, i32
  }
  func.func @transform_4(%arg0: i32, %arg1: i32) -> (i32, i32) {
    %c0_i32 = arith.constant 0 : i32
    %c0_i32_0 = arith.constant 0 : i32
    return %arg0, %c0_i32 : i32, i32
  }
}

</mosaic_0001>

<bundles_post_ra>
// kernel: tpu_custom_call.1
= control target key start
LH: loop header
LB: loop body
LE: loop exit
PB: predicated region body
PF: predicated region fallthrough
CT: control target
= control target key end

     0   :  { %9 = vsyncpa [#allocation4], 0  ;;  %s373_s0 = inlined_call_operand.hbm [shape: f32[2,4,256], index: 0, kind: input, shape index: {}]   ;;  %s374_s1 = inlined_call_operand.hbm [shape: f32[2,4,128], index: 1, kind: input, shape index: {}]   ;;  %s375_s2 = inlined_call_operand.hbm [shape: f32[4,128], index: 2, kind: input, shape index: {}]   ;;  %s376_s3 = inlined_call_operand.vmem [shape: f32[1,128], index: 3, kind: input, shape index: {}]   ;;  %s377_s4 = inlined_call_operand.hbm [shape: f32[2,128], index: 4, kind: output, shape index: {}]  }
   0x1   :  { %10 = vsyncpa [#allocation7], 0 }
   0x2   :  { %11 = vsyncpa [#allocation5], 0  ;;  %s323_s15 = smov [#allocation6]  }
   0x3   :  { %s29_s16 = sshll.u32 %s323_s15, 4  ;;  %s30_s16 = int_to_ptr.vmem [resolvable:$true] %s29_s16 }
   0x4   :  { %s245_s17 = scalar_lea.vmem %s30_s16, 128  ;;  %p250_p1 = scmp.lt.s32.totalorder %s30_s16, %s30_s16 }
   0x5   :  { %p246_p0 = scmp.ne.s32.totalorder %s30_s16, %s245_s17  ;;  %p251_p2 = scmp.lt.s32.totalorder %s245_s17, %s245_s17 }
   0x7   :  { %p252_p3 = por %p251_p2, %p250_p1 }
   0x9   :  { %p253_p4 = pnand %p252_p3, %p246_p0 }
   0xb   :  { %256 = shalt.err (!%p253_p4)
}
   0xc   :  { %s324_s18 = smov 64   ;;  %s325_s19 = smov 4  }
   0xd   :  { %35 = dma.hbm_to_vmem [thread:$0]  %s374_s1, 128, %s30_s16, [#allocation7], %s324_s18, %s324_s18, %s325_s19  }
   0xe   :  { %s326_s22 = smov [#allocation3]  }
   0xf   :  { %s17_s23 = sshll.u32 %s326_s22, 4  ;;  %s18_s23 = int_to_ptr.vmem [resolvable:$true] %s17_s23 }
  0x10   :  { %s265_s24 = scalar_lea.vmem %s18_s23, 256  ;;  %p270_p6 = scmp.lt.s32.totalorder %s18_s23, %s18_s23 }
  0x11   :  { %p266_p5 = scmp.ne.s32.totalorder %s18_s23, %s265_s24  ;;  %p271_p7 = scmp.lt.s32.totalorder %s265_s24, %s265_s24 }
  0x13   :  { %p272_p8 = por %p271_p7, %p270_p6 }
  0x15   :  { %p273_p9 = pnand %p272_p8, %p266_p5 }
  0x17   :  { %276 = shalt.err (!%p273_p9)
}
  0x18   :  { %s327_s25 = smov 128   ;;  %s328_s26 = smov 8  }
  0x19   :  { %23 = dma.hbm_to_vmem [thread:$0]  %s373_s0, 256, %s18_s23, [#allocation4], %s327_s25, %s327_s25, %s328_s26  }
  0x1a   :  { %s329_s29 = smov [#allocation8]  }
  0x1b   :  { %s42_s30 = sshll.u32 %s329_s29, 4  ;;  %s43_s30 = int_to_ptr.vmem [resolvable:$true] %s42_s30 }
  0x1c   :  { %s285_s1 = scalar_lea.vmem %s43_s30, 64  ;;  %p290_p11 = scmp.lt.s32.totalorder %s43_s30, %s43_s30 }
  0x1d   :  { %p286_p10 = scmp.ne.s32.totalorder %s43_s30, %s285_s1  ;;  %p291_p12 = scmp.lt.s32.totalorder %s285_s1, %s285_s1 }
  0x1f   :  { %p292_p13 = por %p291_p12, %p290_p11 }
  0x21   :  { %p293_p0 = pnand %p292_p13, %p286_p10 }
  0x23   :  { %296 = shalt.err (!%p293_p0)
}
  0x24   :  { %45 = dma.hbm_to_vmem [thread:$0]  %s375_s2, 64, %s43_s30, [#allocation7]  }
  0x25   :  { %317 = dma.done.wait [#allocation4], 256  }
  0x26   :  { %318 = vsyncadd [#allocation4], 4294967040 }
  0x27   :  { %319 = dma.done.wait [#allocation7], 192  }
  0x28   :  { %320 = vsyncadd [#allocation7], 4294967104  ;;  %v330_v0 = vmov 0.0   ;;  %v63_v1 = vld [vmem:[#allocation6] sm:$0xf]  ;;  %vm95_vm0 = vcmask 1043456   ;;  %v112_v30 = vlaneseq }
  0x29   :  { %61 = vst [vmem:[#allocation2] sm:$0xf] %v330_v0  ;;  %62 = vst [vmem:[#allocation2 + $0x4] sm:$0xf] %v330_v0  ;;  %222 = vmatprep.subr.mxu0 %v330_v0  ;;  %v65_v2 = vld [vmem:[#allocation6 + $0x4] sm:$0xf] }
  0x2a   :  { %v66_v3 = vld [vmem:[#allocation3] sm:$0xf]  ;;  %v74_v5 = vld [vmem:[#allocation3 + $0x4] sm:$0xf]  ;;  %v67_v6 = vld [vmem:[#allocation3 + $0x8] sm:$0xf] }
  0x2b   :  { %v68_v4 = vmul.f32 %v66_v3, %v63_v1  ;;  %v76_v7 = vmul.f32 %v74_v5, %v63_v1  ;;  %v69_v8 = vmul.f32 %v67_v6, %v63_v1  ;;  %v75_v9 = vld [vmem:[#allocation3 + $0xc] sm:$0xf]  ;;  %v102_v29 = vld [vmem:[#allocation8] sm:$0xf]  ;;  %vm331_vm1 = vmmov 0   ;;  %s332_s7 = smov [#allocation9]  }
  0x2c   :  { %v77_v11 = vmul.f32 %v75_v9, %v63_v1  ;;  %223 = vmatpush3.msk.msra.mxu0 %vm95_vm0, %v102_v29  ;;  %224 = vmatprep.mubr.msk.f32.mxu0 %vm331_vm1, %v330_v0  ;;  %v113_v31 = vand.u32 127, %v112_v30  ;;  %v115_v32 = vshrl.u32 %v112_v30, 7  ;;  %vm122_vm2 = vcmask 1041409   ;;  %v217_v39 = vld [vmem:[%s376_s3] ss:$0 sm:$0xff]  ;;  %s207_s8 = sshll.u32 %s332_s7, 4  ;;  %s208_s8 = int_to_ptr.vmem [resolvable:$true] %s207_s8 }
  0x2d   :  { %v70_v10 = vadd.f32 %v68_v4, %v65_v2  ;;  %v78_v12 = vadd.f32 %v76_v7, %v65_v2  ;;  %v71_v13 = vadd.f32 %v69_v8, %v65_v2  ;;  %vm124_vm3 = vcmask 31744   ;;  %s297_s9 = scalar_lea.vmem %s208_s8, 32  ;;  %p302_p2 = scmp.lt.s32.totalorder %s208_s8, %s208_s8 }
  0x2e   :  { %v79_v15 = vadd.f32 %v77_v11, %v65_v2  ;;  %v116_v34 = vsub.s32 %v113_v31, %v115_v32  ;;  %p298_p1 = scmp.ne.s32.totalorder %s208_s8, %s297_s9  ;;  %p303_p3 = scmp.lt.s32.totalorder %s297_s9, %s297_s9 }
  0x2f   :  { %v72_v14 = vmax.f32 %v70_v10, 0.0  ;;  %v80_v16 = vmax.f32 %v78_v12, 0.0  ;;  %v73_v17 = vmax.f32 %v71_v13, 0.0 }
  0x30   :  { %v84_v18 = vld [vmem:[#allocation2] sm:$0xf]  ;;  %v81_v19 = vmax.f32 %v79_v15, 0.0  ;;  %v85_v21 = vld [vmem:[#allocation2 + $0x4] sm:$0xf]  ;;  %p304_p4 = por %p303_p3, %p302_p2 }
  0x31   :  { %v82_v20 = vadd.f32 %v80_v16, %v72_v14 }
  0x32   :  { %v83_v22 = vadd.f32 %v81_v19, %v73_v17  ;;  %p305_p5 = pnand %p304_p4, %p298_p1 }
  0x33   :  { %v86_v23 = vadd.f32 %v84_v18, %v82_v20 }
  0x34   :  { %v87_v24 = vadd.f32 %v85_v21, %v83_v22 }
  0x35   :  { %88 = vst [vmem:[#allocation2] sm:$0xf] %v86_v23 }
  0x36   :  { %89 = vst [vmem:[#allocation2 + $0x4] sm:$0xf] %v87_v24 }
  0x3c   :  { %v93_v25 = vld [vmem:[#allocation2] sm:$0xf] }
  0x3d   :  { %v96_v26 = vsel %vm95_vm0, %v93_v25, 0.0  ;;  %v94_v27 = vld [vmem:[#allocation2 + $0x4] sm:$0xf] }
  0x3e   :  { %97 = vadd.xlane.f32.xlu0 %v96_v26  ;;  %v99_v28 = vsel %vm95_vm0, %v94_v27, 0.0 }
  0x42   :  { %100 = vadd.xlane.f32.xlu0 %v99_v28 }
  0xc7   :  { %v98_v33 = vpop.xlane.xlu0 %97 }
  0xc8   :  { %v117_v36 = vrot.slane %v98_v33, %v116_v34 }
  0xcb   :  { %v101_v35 = vpop.xlane.xlu0 %100 }
  0xcc   :  { %v121_v37 = vrot.slane %v101_v35, %v116_v34 }
  0xce   :  { %v123_v38 = vsel %vm122_vm2, %v121_v37, %v117_v36 }
  0xcf   :  { %225 = vmatmul.mubr.msk.f32.vlgmr.msra.gmra.mxu0 %vm124_vm3, %v123_v38 }
 0x18f   :  { %v196_v40 = vpop.f32.mrf.mxu0 }
 0x190   :  { %v197_v41 = vadd.f32 %v217_v39, %v196_v40 }
 0x191   :  { %v226_v42 = vpop.f32.mrf.mxu0 }
 0x192   :  { %200 = vst [vmem:[#allocation9] sm:$0x3] %v197_v41 }
 0x193   :  { %308 = shalt.err (!%p305_p5)
}
 0x194   :  { %210 = dma.vmem_to_hbm [thread:$0]  %s208_s8, 32, %s377_s4, [#allocation5]  }
 0x195   :  { %321 = dma.done.wait [#allocation5], 32  }
 0x196   :  { %322 = vsyncadd [#allocation5], 4294967264 }
 0x197   :  { %214 = vsyncpa [#allocation4], 1 }
 0x198   :  { %215 = vsyncpa [#allocation7], 1 }
 0x199   :  { %216 = vsyncpa [#allocation5], 1 }

</bundles_post_ra>
